<compile_context>
chip_gen: v7x
topology: tpu7x:2x2x1
jax: 0.10.0
libtpu: 0.0.40
codegen_flags: <defaults>
</compile_context>

<pallas_src>
import jax
import jax.numpy as jnp
from jax import lax
from jax.experimental import pallas as pl
from jax.experimental.pallas import tpu as pltpu


# ---------------------------------------------------------------------------
# Fused kernel: backbone matmul + ReLU -> mean collapse (sublane reduce) -> VQ quantize + per-row SSE
# ---------------------------------------------------------------------------
def _make_kernel(T):
    inv_T = 1.0 / T

    def kernel(frames_ref, w_ref, b_ref, cb_ref, cbsq_ref, xq_ref, idx_ref, sse_ref):
        # frames_ref: (bn*T, K)   w_ref: (K, D)   b_ref: (1, D)
        # cb_ref:     (V, D)      cbsq_ref: (1, V)
        # xq_ref:     (bn, D)     idx_ref: (bn, 1) i32  sse_ref: (bn, 1) f32
        h = jnp.dot(frames_ref[...], w_ref[...], preferred_element_type=jnp.float32)
        h = jnp.maximum(h + b_ref[...], 0.0)                 # backbone feature nonlinearity (ReLU)

        bnT, D = h.shape
        bn = bnT // T
        # collapse(): mean over the T consecutive frames of each row.  Frames of one row are T
        # consecutive sublanes, so this is a cheap sublane-group reduce (exactly within-vreg when
        # T == 8) -- no MXU, no quadratic averaging operand.
        z = jnp.sum(h.reshape(bn, T, D), axis=1) * inv_T      # (bn, D)

        cb = cb_ref[...]
        V = cb.shape[0]
        # argmin_v ||z - c_v||^2 == argmin_v ( -2 z.c_v + ||c_v||^2 )  (||z||^2 is a per-row constant)
        scores = -2.0 * jnp.dot(z, cb.T, preferred_element_type=jnp.float32) + cbsq_ref[...]
        min_s = jnp.min(scores, axis=-1, keepdims=True)
        lane_iota = lax.broadcasted_iota(jnp.int32, (bn, V), 1)
        # First-occurrence argmin (matches jnp.argmin).  Exact-equality vs min_s is safe because
        # min_s is one of the f32 score values computed in the same dtype/order.
        # NOTE: assumes no NaNs in z / codebook (NaN scores would give idx == V and an all-zero
        # one-hot, diverging from torch/jnp argmin semantics).
        idx = jnp.min(jnp.where(scores == min_s, lane_iota, V), axis=-1, keepdims=True)   # (bn, 1)
        onehot = (lane_iota == idx).astype(jnp.float32)
        xq = jnp.dot(onehot, cb, preferred_element_type=jnp.float32)          # codebook gather on MXU

        xq_ref[...] = xq
        idx_ref[...] = idx.astype(jnp.int32)
        diff = z - xq
        # Per-row sum of squared diff; the wrapper reduces to the scalar loss (keeps the grid 'parallel').
        sse_ref[...] = jnp.sum(diff * diff, axis=-1, keepdims=True)

    return kernel


# ---------------------------------------------------------------------------
# VMEM accounting (lane/sublane padding + buffer counts) and tile-size selection.
# ---------------------------------------------------------------------------
def _pad_lane(c):
    return ((c + 127) // 128) * 128


def _pad_sub(r):
    return ((r + 7) // 8) * 8


def _frames_block_bytes(bn, T, K):
    # frames block (bn*T, K) is lane-padded to 128 in VMEM (K=32 -> 4x nominal bytes).
    return _pad_sub(bn * T) * _pad_lane(K) * 4


def _vmem_step_bytes(bn, T, K, D, V, nbuf):
    frames = _frames_block_bytes(bn, T, K) * nbuf
    # outputs: xq (bn, D), idx (bn, 1), sse (bn, 1) -- double-buffered by the pipeline.
    outs = (_pad_sub(bn) * _pad_lane(D) + 2 * _pad_sub(bn) * _pad_lane(1)) * 4 * 2
    # resident constant operands (w, b, cb, cb_sq); counted x2 (default double buffer) --
    # they are tiny (<~64 KiB total) so single-buffering them is not worth the complexity.
    consts = (_pad_sub(K) * _pad_lane(D) + _pad_sub(1) * _pad_lane(D)
              + _pad_sub(V) * _pad_lane(D) + _pad_sub(1) * _pad_lane(V)) * 4 * 2
    return frames + outs + consts


def _vmem_limit_bytes():
    # Generation-aware VMEM limit: half of physical per-TC VMEM, capped at 64 MiB.
    #   v7x (64 MiB/TC)   -> 32 MiB (scoped default, both TCs active)
    #   v5e/v6e (128 MiB) -> 64 MiB (lets bn grow well past the old 32 MiB limit)
    cap = None
    try:
        cap = pltpu.get_tpu_info().vmem_capacity_bytes
    except Exception:
        cap = None
    if not cap:
        cap = 64 * 1024 * 1024          # conservative fallback = v7x per-TC VMEM
    return min(cap // 2, 64 * 1024 * 1024)


def _pick_bn(N, T, K, D, V, budget_bytes):
    """Largest bn (rows/tile) whose properly-padded, buffered footprint fits the budget.

    Guarantees >= 2 grid steps whenever N > 8 so v7x's two TensorCores both get work
    (grid axis is 'parallel').  Returns (bn, frames_buffer_count).
    """
    for cand in (4096, 2048, 1024, 512, 256, 128, 64, 32, 16, 8):
        if N > 8 and cand >= N:         # keep >= 2 tiles for v7x dual-TC sharding
            continue
        if cand > max(N, 8):
            continue
        num_tiles = -(-N // cand)
        # frames is the only per-step-varying input; deepen its pipeline only while the block is
        # small (< 1 MiB) and there are enough steps -- for big tiles the third buffer is VMEM
        # better spent on bn itself.
        nbuf = 3 if (_frames_block_bytes(cand, T, K) < (1 << 20) and num_tiles >= 4) else 2
        if _vmem_step_bytes(cand, T, K, D, V, nbuf) <= budget_bytes:
            return cand, nbuf
    return 8, 2


# ---------------------------------------------------------------------------
# Wrapper
# ---------------------------------------------------------------------------
def local_encoder_forward(x, w, b, codebook, *, frame_size):
    """x: (B, chunks, samples) f32 -> (xq (B,chunks,D), indices (B,chunks) i32, codebook_loss scalar)."""
    B, chunks, samples = x.shape
    K = frame_size
    assert samples % K == 0, "samples must be a multiple of the frame size"
    N = B * chunks
    T = samples // K
    D = w.shape[1]
    V = codebook.shape[0]

    vmem_limit = _vmem_limit_bytes()
    budget = max(vmem_limit - 4 * 1024 * 1024, 8 * 1024 * 1024)   # headroom for compiler scratch
    bn, nbuf = _pick_bn(N, T, K, D, V, budget)

    # Pad N up to a multiple of bn so awkward N never falls back to one huge (budget-ignoring) tile;
    # padded rows are sliced off (and excluded from the loss) after the call.
    N_pad = -(-N // bn) * bn
    num_tiles = N_pad // bn

    frames2d = x.reshape(N * T, K)                  # glue: patchify (conv1d kernel=stride=K), free view
    if N_pad != N:
        frames2d = jnp.pad(frames2d, ((0, (N_pad - N) * T), (0, 0)))

    # ||c_v||^2 as a tiny resident (1, V) operand (wrapper-side to avoid an in-kernel
    # sublane->lane relayout; negligible at any V).
    cb_sq = jnp.sum(codebook * codebook, axis=-1)[None, :]

    frames_block = (bn * T, K)
    if nbuf != 2:
        frames_spec = pl.BlockSpec(frames_block, lambda i: (i, 0), pipeline_mode=pl.Buffered(nbuf))
    else:
        frames_spec = pl.BlockSpec(frames_block, lambda i: (i, 0))

    # TODO(synk): optional bf16 cast of frames/w (f32 accumulate) would ~halve the dominant HBM read
    # stream on v5e/v6e, at the cost of diverging from the f32 reference numerics -- kept f32 here.
    xq, idx, sse = pl.pallas_call(
        _make_kernel(T),
        out_shape=(
            jax.ShapeDtypeStruct((N_pad, D), jnp.float32),
            jax.ShapeDtypeStruct((N_pad, 1), jnp.int32),
            jax.ShapeDtypeStruct((N_pad, 1), jnp.float32),
        ),
        grid_spec=pltpu.PrefetchScalarGridSpec(
            num_scalar_prefetch=0,
            grid=(num_tiles,),
            in_specs=[
                frames_spec,
                pl.BlockSpec((K, D), lambda i: (0, 0)),     # resident constants (tiny)
                pl.BlockSpec((1, D), lambda i: (0, 0)),
                pl.BlockSpec((V, D), lambda i: (0, 0)),
                pl.BlockSpec((1, V), lambda i: (0, 0)),
            ],
            out_specs=(
                pl.BlockSpec((bn, D), lambda i: (i, 0)),
                pl.BlockSpec((bn, 1), lambda i: (i, 0)),
                pl.BlockSpec((bn, 1), lambda i: (i, 0)),
            ),
        ),
        compiler_params=pltpu.CompilerParams(
            dimension_semantics=("parallel",),              # whole grid parallel (v7x 2-TC sharding)
            vmem_limit_bytes=vmem_limit,                    # 32 MiB on v7x, 64 MiB on v5e/v6e
        ),
    )(frames2d, w, b, codebook, cb_sq)

    xq = xq[:N].reshape(B, chunks, D)
    indices = idx[:N].reshape(B, chunks)
    codebook_loss = jnp.sum(sse[:N]) / (N * D)              # mean((z - xq)^2) over all elements
    return xq, indices, codebook_loss


# ---------------------------------------------------------------------------
# Pure-JAX reference (sanity check)
# ---------------------------------------------------------------------------
def _reference(x, w, b, codebook, *, frame_size):
    B, chunks, samples = x.shape
    N = B * chunks
    K = frame_size
    T = samples // K
    frames = x.reshape(N, T, K)
    h = jax.nn.relu(jnp.einsum("ntk,kd->ntd", frames, w) + b[None])
    z = h.mean(axis=1)                                            # mean collapse
    d = jnp.sum((z[:, None, :] - codebook[None, :, :]) ** 2, -1)  # (N, V)
    idx = jnp.argmin(d, axis=-1)
    xq = codebook[idx]
    loss = jnp.mean((z - xq) ** 2)
    return xq.reshape(B, chunks, -1), idx.reshape(B, chunks), loss


if __name__ == "__main__":
    B, chunks, samples = 2, 8, 256     # x: (batch, chunks, samples) -> N=16, exercises a 2-tile grid
    K, D, V = 32, 64, 16               # frame size, embed dim, codebook size

    key = jax.random.PRNGKey(0)
    kx, kw, kb, kc = jax.random.split(key, 4)
    x = jax.random.normal(kx, (B, chunks, samples), dtype=jnp.float32)
    w = jax.random.normal(kw, (K, D), dtype=jnp.float32) * 0.1
    b = jax.random.normal(kb, (1, D), dtype=jnp.float32) * 0.01
    codebook = jax.random.normal(kc, (V, D), dtype=jnp.float32) * 0.1

    xq, indices, loss = local_encoder_forward(x, w, b, codebook, frame_size=K)
    jax.block_until_ready((xq, indices, loss))

    xq_r, idx_r, loss_r = _reference(x, w, b, codebook, frame_size=K)
    assert xq.shape == (B, chunks, D) and indices.shape == (B, chunks)
    assert jnp.allclose(xq, xq_r, rtol=1e-4, atol=1e-4)
    assert jnp.all(indices == idx_r.astype(jnp.int32))
    assert jnp.allclose(loss, loss_r, rtol=1e-4, atol=1e-5)

    print("KERNEL_OK")
</pallas_src>

<mosaic_0001>
module attributes {stable_mosaic.version = 11 : i64} {
  func.func @kernel(%arg0: i32, %arg1: memref<64x32xf32, #tpu.memory_space<vmem>>, %arg2: memref<32x64xf32, #tpu.memory_space<vmem>>, %arg3: memref<1x64xf32, #tpu.memory_space<vmem>>, %arg4: memref<16x64xf32, #tpu.memory_space<vmem>>, %arg5: memref<1x16xf32, #tpu.memory_space<vmem>>, %arg6: memref<8x64xf32, #tpu.memory_space<vmem>>, %arg7: memref<8x1xi32, #tpu.memory_space<vmem>>, %arg8: memref<8x1xf32, #tpu.memory_space<vmem>>) attributes {dimension_semantics = [#tpu.dimension_semantics<parallel>], iteration_bounds = array<i64: 2>, scalar_prefetch = 0 : i64, scratch_operands = 0 : i64, tpu.core_type = #tpu.core_type<tc>, window_params = [{transform_indices = @transform_0, window_bounds = array<i64: 64, 32>}, {pipeline_mode = #tpu.pipeline_mode<synchronous>, transform_indices = @transform_1, window_bounds = array<i64: 32, 64>}, {pipeline_mode = #tpu.pipeline_mode<synchronous>, transform_indices = @transform_2, window_bounds = array<i64: 1, 64>}, {pipeline_mode = #tpu.pipeline_mode<synchronous>, transform_indices = @transform_3, window_bounds = array<i64: 16, 64>}, {pipeline_mode = #tpu.pipeline_mode<synchronous>, transform_indices = @transform_4, window_bounds = array<i64: 1, 16>}, {transform_indices = @transform_5, window_bounds = array<i64: 8, 64>}, {transform_indices = @transform_6, window_bounds = array<i64: 8, 1>}, {transform_indices = @transform_7, window_bounds = array<i64: 8, 1>}]} {
    %c0 = arith.constant 0 : index
    %c0_0 = arith.constant 0 : index
    %0 = vector.load %arg1[%c0, %c0_0] : memref<64x32xf32, #tpu.memory_space<vmem>>, vector<64x32xf32>
    %c0_1 = arith.constant 0 : index
    %c0_2 = arith.constant 0 : index
    %1 = vector.load %arg2[%c0_1, %c0_2] : memref<32x64xf32, #tpu.memory_space<vmem>>, vector<32x64xf32>
    %cst = arith.constant dense<0.000000e+00> : vector<64x64xf32>
    %2 = tpu.matmul %0, %1, %cst {dimension_numbers = #tpu.dot_dimension_numbers<[1], [0], [0], [1], [0, 0, 1, 1], [], []>} : vector<64x32xf32>, vector<32x64xf32>, vector<64x64xf32> -> vector<64x64xf32>
    %c0_3 = arith.constant 0 : index
    %c0_4 = arith.constant 0 : index
    %3 = vector.load %arg3[%c0_3, %c0_4] : memref<1x64xf32, #tpu.memory_space<vmem>>, vector<1x64xf32>
    %4 = vector.broadcast %3 : vector<1x64xf32> to vector<64x64xf32>
    %5 = arith.addf %2, %4 : vector<64x64xf32>
    %cst_5 = arith.constant 0.000000e+00 : f32
    %6 = vector.broadcast %cst_5 : f32 to vector<64x64xf32>
    %7 = arith.maximumf %5, %6 : vector<64x64xf32>
    %8 = vector.shape_cast %7 : vector<64x64xf32> to vector<8x8x64xf32>
    %cst_6 = arith.constant dense<0.000000e+00> : vector<8x64xf32>
    %9 = vector.multi_reduction <add>, %8, %cst_6 [1] : vector<8x8x64xf32> to vector<8x64xf32>
    %cst_7 = arith.constant 1.250000e-01 : f32
    %10 = vector.broadcast %cst_7 : f32 to vector<8x64xf32>
    %11 = arith.mulf %9, %10 : vector<8x64xf32>
    %c0_8 = arith.constant 0 : index
    %c0_9 = arith.constant 0 : index
    %12 = vector.load %arg4[%c0_8, %c0_9] : memref<16x64xf32, #tpu.memory_space<vmem>>, vector<16x64xf32>
    %13 = tpu.transpose %12, [1, 0] : vector<16x64xf32> -> vector<64x16xf32>
    %cst_10 = arith.constant dense<0.000000e+00> : vector<8x16xf32>
    %14 = tpu.matmul %11, %13, %cst_10 {dimension_numbers = #tpu.dot_dimension_numbers<[1], [0], [0], [1], [0, 0, 1, 1], [], []>} : vector<8x64xf32>, vector<64x16xf32>, vector<8x16xf32> -> vector<8x16xf32>
    %cst_11 = arith.constant -2.000000e+00 : f32
    %15 = vector.broadcast %cst_11 : f32 to vector<8x16xf32>
    %16 = arith.mulf %15, %14 : vector<8x16xf32>
    %c0_12 = arith.constant 0 : index
    %c0_13 = arith.constant 0 : index
    %17 = vector.load %arg5[%c0_12, %c0_13] : memref<1x16xf32, #tpu.memory_space<vmem>>, vector<1x16xf32>
    %18 = vector.broadcast %17 : vector<1x16xf32> to vector<8x16xf32>
    %19 = arith.addf %16, %18 : vector<8x16xf32>
    %cst_14 = arith.constant dense<0x7F800000> : vector<8xf32>
    %20 = vector.multi_reduction <minimumf>, %19, %cst_14 [1] : vector<8x16xf32> to vector<8xf32>
    %21 = vector.shape_cast %20 : vector<8xf32> to vector<8x1xf32>
    %22 = tpu.iota {dimensions = array<i32: 1>} : vector<8x16xi32>
    %23 = vector.broadcast %21 : vector<8x1xf32> to vector<8x16xf32>
    %24 = arith.cmpf oeq, %19, %23 : vector<8x16xf32>
    %c16_i32 = arith.constant 16 : i32
    %25 = vector.broadcast %c16_i32 : i32 to vector<8x16xi32>
    %26 = arith.select %24, %22, %25 : vector<8x16xi1>, vector<8x16xi32>
    %cst_15 = arith.constant dense<2147483647> : vector<8xi32>
    %27 = vector.multi_reduction <minsi>, %26, %cst_15 [1] : vector<8x16xi32> to vector<8xi32>
    %28 = vector.shape_cast %27 : vector<8xi32> to vector<8x1xi32>
    %29 = vector.broadcast %28 : vector<8x1xi32> to vector<8x16xi32>
    %30 = arith.cmpi eq, %22, %29 : vector<8x16xi32>
    %31 = arith.extui %30 : vector<8x16xi1> to vector<8x16xi32>
    %32 = arith.sitofp %31 : vector<8x16xi32> to vector<8x16xf32>
    %cst_16 = arith.constant dense<0.000000e+00> : vector<8x64xf32>
    %33 = tpu.matmul %32, %12, %cst_16 {dimension_numbers = #tpu.dot_dimension_numbers<[1], [0], [0], [1], [0, 0, 1, 1], [], []>} : vector<8x16xf32>, vector<16x64xf32>, vector<8x64xf32> -> vector<8x64xf32>
    %c0_17 = arith.constant 0 : index
    %c0_18 = arith.constant 0 : index
    %34 = vector.load %arg6[%c0_17, %c0_18] : memref<8x64xf32, #tpu.memory_space<vmem>>, vector<8x64xf32>
    tpu.vector_store %arg6[%c0_17, %c0_18], %33 {strides = array<i32>} : memref<8x64xf32, #tpu.memory_space<vmem>>, vector<8x64xf32>,
    %c0_19 = arith.constant 0 : index
    %c0_20 = arith.constant 0 : index
    %35 = vector.load %arg7[%c0_19, %c0_20] : memref<8x1xi32, #tpu.memory_space<vmem>>, vector<8x1xi32>
    tpu.vector_store %arg7[%c0_19, %c0_20], %28 {strides = array<i32>} : memref<8x1xi32, #tpu.memory_space<vmem>>, vector<8x1xi32>,
    %36 = arith.subf %11, %33 : vector<8x64xf32>
    %37 = arith.mulf %36, %36 : vector<8x64xf32>
    %cst_21 = arith.constant dense<0.000000e+00> : vector<8xf32>
    %38 = vector.multi_reduction <add>, %37, %cst_21 [1] : vector<8x64xf32> to vector<8xf32>
    %39 = vector.shape_cast %38 : vector<8xf32> to vector<8x1xf32>
    %c0_22 = arith.constant 0 : index
    %c0_23 = arith.constant 0 : index
    %40 = vector.load %arg8[%c0_22, %c0_23] : memref<8x1xf32, #tpu.memory_space<vmem>>, vector<8x1xf32>
    tpu.vector_store %arg8[%c0_22, %c0_23], %39 {strides = array<i32>} : memref<8x1xf32, #tpu.memory_space<vmem>>, vector<8x1xf32>,
    return
  }
  func.func @transform_0(%arg0: i32) -> (i32, i32) {
    %c0_i32 = arith.constant 0 : i32
    %c0_i32_0 = arith.constant 0 : i32
    return %arg0, %c0_i32 : i32, i32
  }
  func.func @transform_1(%arg0: i32) -> (i32, i32) {
    %c0_i32 = arith.constant 0 : i32
    %c0_i32_0 = arith.constant 0 : i32
    %c0_i32_1 = arith.constant 0 : i32
    return %c0_i32, %c0_i32_0 : i32, i32
  }
  func.func @transform_2(%arg0: i32) -> (i32, i32) {
    %c0_i32 = arith.constant 0 : i32
    %c0_i32_0 = arith.constant 0 : i32
    %c0_i32_1 = arith.constant 0 : i32
    return %c0_i32, %c0_i32_0 : i32, i32
  }
  func.func @transform_3(%arg0: i32) -> (i32, i32) {
    %c0_i32 = arith.constant 0 : i32
    %c0_i32_0 = arith.constant 0 : i32
    %c0_i32_1 = arith.constant 0 : i32
    return %c0_i32, %c0_i32_0 : i32, i32
  }
  func.func @transform_4(%arg0: i32) -> (i32, i32) {
    %c0_i32 = arith.constant 0 : i32
    %c0_i32_0 = arith.constant 0 : i32
    %c0_i32_1 = arith.constant 0 : i32
    return %c0_i32, %c0_i32_0 : i32, i32
  }
  func.func @transform_5(%arg0: i32) -> (i32, i32) {
    %c0_i32 = arith.constant 0 : i32
    %c0_i32_0 = arith.constant 0 : i32
    return %arg0, %c0_i32 : i32, i32
  }
  func.func @transform_6(%arg0: i32) -> (i32, i32) {
    %c0_i32 = arith.constant 0 : i32
    %c0_i32_0 = arith.constant 0 : i32
    return %arg0, %c0_i32 : i32, i32
  }
  func.func @transform_7(%arg0: i32) -> (i32, i32) {
    %c0_i32 = arith.constant 0 : i32
    %c0_i32_0 = arith.constant 0 : i32
    return %arg0, %c0_i32 : i32, i32
  }
}

</mosaic_0001>

<bundles_post_ra>
// kernel: tpu_custom_call.1
= control target key start
LH: loop header
LB: loop body
LE: loop exit
PB: predicated region body
PF: predicated region fallthrough
CT: control target
= control target key end

     0   :  { %13 = vsyncpa [#allocation3], 0  ;;  %s1398_s0 = inlined_call_operand.vmem [shape: f32[128,32], index: 0, kind: input, shape index: {}]   ;;  %s1399_s1 = inlined_call_operand.vmem [shape: f32[32,64], index: 1, kind: input, shape index: {}]   ;;  %s1400_s2 = inlined_call_operand.vmem [shape: f32[1,64], index: 2, kind: input, shape index: {}]   ;;  %s1401_s3 = inlined_call_operand.vmem [shape: f32[16,64], index: 3, kind: input, shape index: {}]   ;;  %s1402_s4 = inlined_call_operand.vmem [shape: f32[1,16], index: 4, kind: input, shape index: {}]   ;;  %s1403_s5 = inlined_call_operand.hbm [shape: f32[16,64], index: 5, kind: output, shape index: {0}]   ;;  %s1404_s6 = inlined_call_operand.vmem [shape: s32[16,1], index: 6, kind: output, shape index: {1}]   ;;  %s1405_s7 = inlined_call_operand.vmem [shape: f32[16,1], index: 7, kind: output, shape index: {2}]  }
   0x1   :  { %15 = vsyncpa [#allocation3 + $0x1], 0  ;;  %s1174_s24 = smov 0   ;;  %s1176_s25 = smov 0  }
   0x2   :  { %s1178_s26 = smov 0   ;;  %s1180_s27 = smov 0  }
   0x3 LB: > { %s1195_s28 = sadd.s32 4294967295, %s1128_s27   ;;  %s929_s29 = sadd.s32 4294967294, %s1128_s27   ;;  %s1128_s27 = sphi %s1180_s27, %s1413_s27   ;;  %s1124_s26 = sphi %s1178_s26, %s1412_s26   ;;  %s1120_s25 = sphi %s1176_s25, %s1411_s25   ;;  %s1116_s24 = sphi %s1174_s24, %s1410_s24  }
   0x4   : > { %s1199_s30 = sadd.s32 1, %s1128_s27   ;;  %s138_s8 = sadd.s32 1, %s1124_s26 }
   0x5   : > { %s135_s9 = ssub.s32 %s1128_s27, %s1199_s30  ;;  %p148_p0 = scmp.ne.s32.totalorder %s1124_s26, %s1120_s25 }
   0x6   : > { %p136_p1 = scmp.eq.s32.totalorder %s135_s9, 0  ;;  %p149_p2 = scmp.eq.s32.totalorder %s1195_s28, 1 }
   0x7   : > { %p154_p3 = scmp.ne.s32.totalorder %s1120_s25, %s1116_s24  ;;  %p155_p4 = scmp.eq.s32.totalorder %s929_s29, 1 }
   0x8   : > { %s1210_s10 = scalar_select %p136_p1, %s1124_s26, %s138_s8  }
   0x9   : > { %p1212_p5 = por %p149_p2, %p148_p0  ;;  %p1216_p6 = por %p155_p4, %p154_p3 }
   0xa   : > { %p932_p7 = scmp.ge.s32.totalorder %s1128_s27, 1  ;;  %p246_p8 = scmp.lt.s32.totalorder %s1128_s27, 3 }
   0xc   : > { %p247_p9 = pnand %p932_p7, %p246_p8 }
   0xd   : > { %v308_v0 = vld [vmem:[%s1399_s1] sm:$0xff] (!%p247_p9)  ;;  %v309_v1 = vld [vmem:[%s1399_s1 + $0x8] sm:$0xff] (!%p247_p9)  ;;  %v310_v2 = vld [vmem:[%s1399_s1 + $0x10] sm:$0xff] (!%p247_p9)  ;;  %s934_s19 = sshll.u32 (!%p247_p9), %s1195_s28, 3  ;;  %vm319_vm0 = vcmask (!%p247_p9), 261120   ;;  %vm457_vm1 = vcmask (!%p247_p9), 523264  }
   0xe   : > { %250 = sbr.rel (%p247_p9) target bundleno = 1303 (0x517), region = 40  ;;  %v1009_v3 = vpack.c.bf16 (!%p247_p9), %v309_v1, %v308_v0  ;;  %v311_v4 = vld [vmem:[%s1399_s1 + $0x18] sm:$0xff] (!%p247_p9)  ;;  %p287_p10 = scmp.lt.s32.totalorder (!%p247_p9), %s934_s19, 15  ;;  %v522_v14 = vld [vmem:[%s1401_s3] sm:$0xff] (!%p247_p9)  ;;  %v523_v15 = vld [vmem:[%s1401_s3 + $0x8] sm:$0xff] (!%p247_p9)  ;;  %v1130_v17 = vmov (!%p247_p9), 0.0|0.0  }
   0xf   : > { %v1013_v5 = vpack.c.bf16 (!%p247_p9), %v311_v4, %v310_v2  ;;  %v1252_v16 = vpack.c.bf16 (!%p247_p9), %v523_v15, %v522_v14  ;;  %1017 = vmatprep.subr.bf16.mxu1 (!%p247_p9), %v1130_v17  ;;  %vm1019_vm2 = vmpackc.low (!%p247_p9), %vm457_vm1, %vm457_vm1  ;;  %vm1131_vm3 = vmmov (!%p247_p9), 0   ;;  %v1132_v18 = vmov (!%p247_p9), 0.0   ;;  %v938_v19 = vld [vmem:[%s1400_s2] ss:$0 sm:$0xff] (!%p247_p9)  ;;  %p292_p11 = scmp.lt.s32.totalorder (!%p247_p9), %s1195_s28, 1  ;;  %s954_s14 = sshll.u32 (!%p247_p9), %s1195_s28, 7 }
  0x10   : > { %1010 = vmatprep.subr.bf16.mxu0 (!%p247_p9), %v1009_v3  ;;  %999 = vmatprep.mubr.msk.f32.mxu1 (!%p247_p9), %vm1131_vm3, %v1132_v18  ;;  %vm532_vm4 = vcmask (!%p247_p9), 1041409   ;;  %vm534_vm5 = vcmask (!%p247_p9), 1042434   ;;  %vm536_vm6 = vcmask (!%p247_p9), 1043459   ;;  %vm538_vm7 = vcmask (!%p247_p9), 1044484   ;;  %s1354_s18 = scalar_lea.hbm (!%p247_p9), %s1403_s5, %s954_s14  ;;  %s1133_s23 = smov (!%p247_p9), [#allocation2]  }
  0x11   : > { %1012 = vmatpush3.bf16.msra.mxu0 (!%p247_p9), %v1009_v3  ;;  %1020 = vmatpush3.bf16.xpose.msk.msra.mxu1 (!%p247_p9), %vm1019_vm2, %v1252_v16  ;;  %vm540_vm8 = vcmask (!%p247_p9), 1045509   ;;  %vm542_vm9 = vcmask (!%p247_p9), 1046534   ;;  %vm544_vm10 = vcmask (!%p247_p9), 1047559   ;;  %vm633_vm11 = vcmask (!%p247_p9), 130048  }
  0x12   : > { %1014 = vmatprep.subr.bf16.mxu0 (!%p247_p9), %v1013_v5  ;;  %1021 = vmatprep.subr.bf16.mxu1 (!%p247_p9), %v1130_v17  ;;  %vm733_vm14 = vcmask (!%p247_p9), 7168  }
  0x15   : > { %s1415_s19 = smov (!%p287_p10, %s934_s19), 15  ;;  %1016 = vmatpush3.bf16.msra.mxu0 %v1013_v5 }
  0x16   : > { %s935_s22 = sshll.u32 %s1415_s19, 3 }
  0x17   : > { %s290_s8 = scalar_lea.vmem %s1398_s0, %s935_s22 }
  0x18   : > { %v300_v6 = vld [vmem:[%s290_s8] sm:$0xff]  ;;  %v301_v7 = vld [vmem:[%s290_s8 + $0x8] sm:$0xff]  ;;  %v302_v8 = vld [vmem:[%s290_s8 + $0x10] sm:$0xff]  ;;  %s1312_s20 = scalar_select %p292_p11, %s1195_s28, 1 }
  0x19   : > { %983 = vmatprep.mubr.msk.f32.mxu0 %vm319_vm0, %v300_v6  ;;  %v303_v9 = vld [vmem:[%s290_s8 + $0x18] sm:$0xff]  ;;  %v304_v10 = vld [vmem:[%s290_s8 + $0x20] sm:$0xff]  ;;  %v305_v11 = vld [vmem:[%s290_s8 + $0x28] sm:$0xff] }
  0x1a   : > { %984 = vmatmul.mubr.msk.f32.vlgmr.msra.gmra.mrb[0].mxu0 %vm319_vm0, %v301_v7  ;;  %v306_v12 = vld [vmem:[%s290_s8 + $0x30] sm:$0xff]  ;;  %v307_v13 = vld [vmem:[%s290_s8 + $0x38] sm:$0xff]  ;;  %s1406_s21 = sshll.u32 %s1312_s20, 3  ;;  %s271_s8 = sand.u32 1, %s1120_s25  }
  0x1b   : > { %986 = vmatprep.mubr.msk.f32.mxu0 %vm319_vm0, %v302_v8  ;;  %s295_s29 = scalar_lea.vmem %s1404_s6, %s1406_s21  ;;  %s1326_s9 = sshll.u32 %s271_s8, 3 }
  0x1c   : > { %s273_s13 = scalar_lea.vmem [#allocation2], %s1326_s9  ;;  %s795_s19 = scalar_lea.sflag [#allocation3], %s271_s8 }
  0x1d   : > { %s816_s15 = sshll.u32 %s273_s13, 4  ;;  %s817_s15 = int_to_ptr.vmem [resolvable:$true] %s816_s15 }
  0x1e   : > { %987 = vmatmul.mubr.msk.f32.gmra.mrb[2].mxu0 %vm319_vm0, %v303_v9  ;;  %s1066_s22 = scalar_lea.vmem %s817_s15, 128 }
  0x1f   : > { %989 = vmatprep.mubr.msk.f32.mxu0 %vm319_vm0, %v304_v10  ;;  %p1067_p12 = scmp.ne.s32.totalorder %s817_s15, %s1066_s22 }
  0x21   : > { %p1068_p13 = pnand %p1067_p12, %p1212_p5 }
  0x22   : > { %990 = vmatmul.mubr.msk.f32.gmra.mrb[4].mxu0 %vm319_vm0, %v305_v11 }
  0x23   : > { %992 = vmatprep.mubr.msk.f32.mxu0 %vm319_vm0, %v306_v12  ;;  %p1069_p0 = pneg %p1068_p13 }
  0x26   : > { %993 = vmatmul.mubr.msk.f32.gmra.mrb[6].mxu0 %vm319_vm0, %v307_v13 }
  0xed   : > { %v985_v20 = vpop.f32.mrb[0].mxu0 }
  0xee   : > { %v416_v21 = vadd.f32 %v985_v20, %v938_v19  ;;  %v410_v22 = vpop.f32.mrb[1].mxu0 }
  0xef   : > { %v411_v23 = vadd.f32 %v938_v19, %v410_v22 }
  0xf0   : > { %v450_v24 = vmax.f32 %v416_v21, 0.0 }
  0xf1   : > { %v449_v25 = vmax.f32 %v411_v23, 0.0  ;;  %v988_v26 = vpop.f32.mrb[2].mxu0 }
  0xf2   : > { %v465_v27 = vsel %vm457_vm1, %v450_v24, 0.0  ;;  %v426_v28 = vadd.f32 %v988_v26, %v938_v19  ;;  %v420_v29 = vpop.f32.mrb[3].mxu0 }
  0xf3   : > { %v466_v30 = vrot.slane %v465_v27, 4  ;;  %v458_v31 = vsel %vm457_vm1, %v449_v25, 0.0  ;;  %v421_v32 = vadd.f32 %v938_v19, %v420_v29 }
  0xf4   : > { %v459_v33 = vrot.slane %v458_v31, 4  ;;  %v452_v34 = vmax.f32 %v426_v28, 0.0 }
  0xf5   : > { %v467_v35 = vadd.f32 %v466_v30, %v465_v27  ;;  %v451_v36 = vmax.f32 %v421_v32, 0.0  ;;  %v991_v37 = vpop.f32.mrb[4].mxu0 }
  0xf6   : > { %v460_v38 = vadd.f32 %v459_v33, %v458_v31  ;;  %v479_v39 = vsel %vm457_vm1, %v452_v34, 0.0  ;;  %v436_v40 = vadd.f32 %v991_v37, %v938_v19  ;;  %v430_v41 = vpop.f32.mrb[5].mxu0 }
  0xf7   : > { %v468_v42 = vrot.slane %v467_v35, 2  ;;  %v480_v43 = vrot.slane %v479_v39, 4  ;;  %v472_v44 = vsel %vm457_vm1, %v451_v36, 0.0  ;;  %v431_v45 = vadd.f32 %v938_v19, %v430_v41 }
  0xf8   : > { %v461_v46 = vrot.slane %v460_v38, 2  ;;  %v473_v47 = vrot.slane %v472_v44, 4  ;;  %v454_v48 = vmax.f32 %v436_v40, 0.0 }
  0xf9   : > { %v469_v49 = vadd.f32 %v468_v42, %v467_v35  ;;  %v481_v50 = vadd.f32 %v480_v43, %v479_v39  ;;  %v453_v51 = vmax.f32 %v431_v45, 0.0  ;;  %v994_v52 = vpop.f32.mrb[6].mxu0 }
  0xfa   : > { %v462_v53 = vadd.f32 %v461_v46, %v460_v38  ;;  %v474_v54 = vadd.f32 %v473_v47, %v472_v44  ;;  %v493_v55 = vsel %vm457_vm1, %v454_v48, 0.0  ;;  %v446_v56 = vadd.f32 %v994_v52, %v938_v19  ;;  %v440_v57 = vpop.f32.mrb[7].mxu0 }
  0xfb   : > { %v470_v58 = vrot.slane %v469_v49, 1  ;;  %v482_v59 = vrot.slane %v481_v50, 2  ;;  %v494_v60 = vrot.slane %v493_v55, 4  ;;  %v486_v61 = vsel %vm457_vm1, %v453_v51, 0.0 }
  0xfc   : > { %v463_v62 = vrot.slane %v462_v53, 1  ;;  %v475_v63 = vrot.slane %v474_v54, 2  ;;  %v487_v0 = vrot.slane %v486_v61, 4  ;;  %v456_v1 = vmax.f32 %v446_v56, 0.0 }
  0xfd   : > { %v483_v2 = vadd.f32 %v482_v59, %v481_v50  ;;  %v495_v3 = vadd.f32 %v494_v60, %v493_v55  ;;  %v441_v4 = vadd.f32 %v938_v19, %v440_v57  ;;  %v471_v8 = vadd.f32 %v470_v58, %v469_v49 }
  0xfe   : > { %v476_v5 = vadd.f32 %v475_v63, %v474_v54  ;;  %v488_v6 = vadd.f32 %v487_v0, %v486_v61  ;;  %v507_v7 = vsel %vm457_vm1, %v456_v1, 0.0  ;;  %v464_v11 = vadd.f32 %v463_v62, %v462_v53  ;;  %v950_v54 = vld [vmem:[%s1402_s4] ss:$0 sm:$0xff] }
  0xff   : > { %v496_v9 = vrot.slane %v495_v3, 2  ;;  %v508_v10 = vrot.slane %v507_v7, 4  ;;  %v455_v14 = vmax.f32 %v441_v4, 0.0  ;;  %v484_v15 = vrot.slane %v483_v2, 1 }
 0x100   : > { %v477_v12 = vrot.slane %v476_v5, 1  ;;  %v489_v13 = vrot.slane %v488_v6, 2  ;;  %v1270_v25 = vmul.f32 0.125, %v471_v8  ;;  %v1272_v26 = vmul.f32 0.125, %v464_v11 }
 0x101   : > { %v509_v17 = vadd.f32 %v508_v10, %v507_v7  ;;  %v497_v21 = vadd.f32 %v496_v9, %v495_v3  ;;  %v500_v23 = vsel %vm457_vm1, %v455_v14, 0.0  ;;  %v485_v31 = vadd.f32 %v484_v15, %v483_v2 }
 0x102   : > { %v478_v20 = vadd.f32 %v477_v12, %v476_v5  ;;  %v490_v22 = vadd.f32 %v489_v13, %v488_v6  ;;  %v501_v19 = vrot.slane %v500_v23, 4  ;;  %v533_v35 = vsel %vm532_vm4, %v1270_v25, %v1272_v26 }
 0x103   : > { %v510_v24 = vrot.slane %v509_v17, 2  ;;  %v498_v32 = vrot.slane %v497_v21, 1  ;;  %v1283_v40 = vmul.f32 0.125, %v485_v31  ;;  %v637_v59 = vlaneseq }
 0x104   : > { %v491_v27 = vrot.slane %v490_v22, 1  ;;  %v1274_v28 = vmul.f32 0.125, %v478_v20  ;;  %v502_v30 = vadd.f32 %v501_v19, %v500_v23 }
 0x105   : > { %v511_v29 = vadd.f32 %v510_v24, %v509_v17  ;;  %v499_v41 = vadd.f32 %v498_v32, %v497_v21  ;;  %v638_v60 = vand.u32 127, %v637_v59 }
 0x106   : > { %v492_v33 = vadd.f32 %v491_v27, %v490_v22  ;;  %v503_v34 = vrot.slane %v502_v30, 2  ;;  %v535_v37 = vsel %vm534_vm5, %v1274_v28, %v533_v35 }
 0x107   : > { %v512_v36 = vrot.slane %v511_v29, 1  ;;  %v537_v44 = vsel %vm536_vm6, %v1283_v40, %v535_v37  ;;  %v1289_v47 = vmul.f32 0.125, %v499_v41 }
 0x108   : > { %v1281_v38 = vmul.f32 0.125, %v492_v33  ;;  %v504_v39 = vadd.f32 %v503_v34, %v502_v30 }
 0x109   : > { %v513_v43 = vadd.f32 %v512_v36, %v511_v29 }
 0x10a   : > { %v505_v42 = vrot.slane %v504_v39, 1  ;;  %v539_v46 = vsel %vm538_vm7, %v1281_v38, %v537_v44 }
 0x10b   : > { %v1293_v49 = vmul.f32 0.125, %v513_v43  ;;  %v541_v50 = vsel %vm540_vm8, %v1289_v47, %v539_v46 }
 0x10c   : > { %v506_v45 = vadd.f32 %v505_v42, %v504_v39 }
 0x10e   : > { %v1291_v48 = vmul.f32 0.125, %v506_v45 }
 0x110   : > { %v543_v51 = vsel %vm542_vm9, %v1291_v48, %v541_v50 }
 0x111   : > { %v545_v52 = vsel %vm544_vm10, %v1293_v49, %v543_v51 }
 0x112   : > { %1000 = vmatmul.mubr.msk.f32.vlgmr.msra.gmra.mrb[0].mxu1 %vm457_vm1, %v545_v52 }
 0x113   : > { %1023 = vmatpush3.bf16.msra.mxu1 %v1252_v16  ;;  %1006 = vmatprep.mubr.msk.f32.mxu1 %vm1131_vm3, %v1132_v18 }
 0x1e5   : > { %v620_v53 = vpop.f32.mrb[0].mxu1 }
 0x1e6   : > { %v624_v55 = vmul.f32 -2.0, %v620_v53  ;;  %v1001_v56 = vpop.f32.mrb[1].mxu1 }
 0x1e8   : > { %v632_v57 = vadd.f32 %v950_v54, %v624_v55 }
 0x1ea   : > { %v634_v58 = vsel %vm633_vm11, %v632_v57, inf }
 0x1eb   : > { %635 = vmin.xlane.f32.xlu0 %v634_v58 }
 0x278   : > { %v636_v16 = vpop.xlane.xlu0 %635 }
 0x279   : > { %vm639_vm12 = vcmp.eq.f32.partialorder %v632_v57, %v636_v16 }
 0x27a   : > { %v640_v61 = vsel %vm639_vm12, %v638_v60, 16 }
 0x27b   : > { %v641_v62 = vsel %vm633_vm11, %v640_v61, 2147483647 }
 0x27c   : > { %v643_v63 = vshra.s32 %v641_v62, 16  ;;  %v642_v1 = vand.u32 65535, %v641_v62 }
 0x27e   : > { %v645_v0 = vcvt.s32.f32 %v643_v63  ;;  %v644_v3 = vcvt.s32.f32 %v642_v1 }
 0x280   : > { %646 = vmin.xlane.f32.xlu0 %v645_v0 }
 0x30d   : > { %v647_v2 = vpop.xlane.xlu0 %646 }
 0x30e   : > { %vm648_vm13 = vcmp.eq.f32.partialorder %v645_v0, %v647_v2  ;;  %v653_v5 = vcvt.f32.s32 %v647_v2 }
 0x30f   : > { %v649_v4 = vsel %vm648_vm13, %v644_v3, inf }
 0x310   : > { %650 = vmin.xlane.f32.xlu1 %v649_v4  ;;  %v654_v7 = vshll.u32 %v653_v5, 16 }
 0x39d   : > { %v651_v6 = vpop.xlane.xlu1 %650 }
 0x39e   : > { %v652_v8 = vcvt.f32.s32 %v651_v6 }
 0x3a0   : > { %v655_v9 = vadd.s32 %v654_v7, %v652_v8 }
 0x3a2   : > { %vm656_vm15 = vcmp.eq.s32.totalorder %v638_v60, %v655_v9  ;;  %734 = vst.msk [vmem:[%s295_s29] sm:$0xff] %vm733_vm14, %v655_v9  ;;  %s1070_s29 = sshll.u32 %s1133_s23, 4  ;;  %s1071_s29 = int_to_ptr.vmem [resolvable:$false] %s1070_s29 }
 0x3a3   : > { %v951_v10 = vsel %vm656_vm15, 1.0, %v1132_v18  ;;  %s1072_s21 = scalar_lea.vmem %s1071_s29, 256  ;;  %p1073_p1 = scmp.lt.s32.totalorder %s817_s15, %s1071_s29 }
 0x3a4   : > { %1007 = vmatmul.mubr.msk.f32.vlgmr.msra.gmra.mrb[2].mxu1 %vm633_vm11, %v951_v10  ;;  %p1074_p2 = scmp.lt.s32.totalorder %s1072_s21, %s1066_s22 }
 0x3a6   : > { %p1075_p3 = por %p1074_p2, %p1073_p1 }
 0x3a8   : > { %p1076_p4 = pnand %p1075_p3, %p1069_p0 }
 0x477   : > { %v728_v11 = vpop.f32.mrb[2].mxu1 }
 0x478   : > { %v1008_v12 = vpop.f32.mrb[3].mxu1  ;;  %v736_v13 = vrot.slane %v728_v11, 1  ;;  %v737_v14 = vrot.slane %v728_v11, 2  ;;  %v738_v15 = vrot.slane %v728_v11, 3  ;;  %v739_v17 = vrot.slane %v728_v11, 4  ;;  %732 = vst.msk [vmem:[%s273_s13] sm:$0xff] %vm457_vm1, %v728_v11 }
 0x479   : > { %v740_v20 = vrot.slane %v728_v11, 5  ;;  %v741_v18 = vrot.slane %v728_v11, 6  ;;  %v742_v21 = vrot.slane %v728_v11, 7  ;;  %v751_v22 = vsub.f32 %v1272_v26, %v728_v11 }
 0x47a   : > { %v752_v23 = vsub.f32 %v1270_v25, %v736_v13  ;;  %v753_v24 = vsub.f32 %v1274_v28, %v737_v14  ;;  %v754_v19 = vsub.f32 %v1283_v40, %v738_v15  ;;  %v755_v27 = vsub.f32 %v1281_v38, %v739_v17 }
 0x47b   : > { %v756_v29 = vsub.f32 %v1289_v47, %v740_v20  ;;  %v757_v30 = vsub.f32 %v1291_v48, %v741_v18  ;;  %v758_v31 = vsub.f32 %v1293_v49, %v742_v21  ;;  %v759_v36 = vmul.f32 %v751_v22, %v751_v22 }
 0x47c   : > { %v760_v32 = vmul.f32 %v752_v23, %v752_v23  ;;  %v761_v33 = vmul.f32 %v753_v24, %v753_v24  ;;  %v762_v34 = vmul.f32 %v754_v19, %v754_v19  ;;  %v763_v35 = vmul.f32 %v755_v27, %v755_v27 }
 0x47d   : > { %v764_v26 = vmul.f32 %v756_v29, %v756_v29  ;;  %v765_v39 = vmul.f32 %v757_v30, %v757_v30  ;;  %v766_v28 = vmul.f32 %v758_v31, %v758_v31 }
 0x47e   : > { %v775_v37 = vrot.slane %v760_v32, 7  ;;  %v777_v25 = vrot.slane %v761_v33, 6  ;;  %v779_v40 = vrot.slane %v762_v34, 5  ;;  %v781_v42 = vrot.slane %v763_v35, 4 }
 0x47f   : > { %v783_v44 = vrot.slane %v764_v26, 3  ;;  %v785_v46 = vrot.slane %v765_v39, 2  ;;  %v787_v48 = vrot.slane %v766_v28, 1 }
 0x480   : > { %v776_v38 = vsel %vm532_vm4, %v775_v37, %v759_v36 }
 0x481   : > { %v778_v41 = vsel %vm534_vm5, %v777_v25, %v776_v38 }
 0x482   : > { %v780_v43 = vsel %vm536_vm6, %v779_v40, %v778_v41 }
 0x483   : > { %v782_v45 = vsel %vm538_vm7, %v781_v42, %v780_v43 }
 0x484   : > { %v784_v47 = vsel %vm540_vm8, %v783_v44, %v782_v45 }
 0x485   : > { %v786_v49 = vsel %vm542_vm9, %v785_v46, %v784_v47 }
 0x486   : > { %v788_v50 = vsel %vm544_vm10, %v787_v48, %v786_v49 }
 0x487   : > { %v790_v51 = vsel %vm457_vm1, %v788_v50, 0.0 }
 0x488   : > { %791 = vadd.xlane.f32.xlu1 %v790_v51 }
 0x489   : > { %1079 = shalt.err (!%p1076_p4)
}
 0x48a   : > { %s1080_s28 = scalar_lea.hbm %s1354_s18, 128  ;;  %s1084_s13 = scalar_lea.hbm %s1403_s5, 256 }
 0x48b   : > { %p1081_p7 = scmp.ne.s32.totalorder %s1354_s18, %s1080_s28  ;;  %p1085_p10 = scmp.lt.u32.totalorder %s1354_s18, %s1403_s5 }
 0x48c   : > { %p1086_p11 = scmp.lt.u32.totalorder %s1084_s13, %s1080_s28  ;;  %p1088_p13 = scmp.lt.u32.totalorder %s1080_s28, %s1354_s18 }
 0x48d   : > { %p1082_p8 = pnand %p1081_p7, %p1212_p5 }
 0x48e   : > { %p1087_p12 = por %p1086_p11, %p1085_p10 }
 0x48f   : > { %p1083_p9 = pneg %p1082_p8 }
 0x490   : > { %p1089_p0 = por %p1088_p13, %p1087_p12 }
 0x492   : > { %p1090_p1 = pnand %p1089_p0, %p1083_p9 }
 0x494   : > { %1093 = shalt.err (!%p1090_p1)
}
 0x495   : > { %1024 = dma.vmem_to_hbm [thread:$0]  (%p1212_p5), %s817_s15, 128, %s1354_s18, %s795_s19  }
 0x496   : > { %s1409_s21 = sshll.u32 %s1312_s20, 3 }
 0x497   : > { %s299_s23 = scalar_lea.vmem %s1405_s7, %s1409_s21 }
 0x515   : > { %v792_v52 = vpop.xlane.xlu1 %791 }
 0x516   : > { %793 = vst.msk [vmem:[%s299_s23] sm:$0xff] %vm733_vm14, %v792_v52 }
 0x517 PF: > { %p1030_p2 = scmp.ge.s32.totalorder %s1128_s27, 2  ;;  %s834_s29 = sand.u32 1, %s1116_s24  }
 0x518   : > { %s835_s11 = scalar_lea.sflag [#allocation3], %s834_s29 }
 0x519   : > { %p1027_p3 = pnand %p1030_p2, %p1216_p6 }
 0x51b   : > { %1111 = dma.done.wait (!%p1027_p3), %s835_s11, 128  }
 0x51c   : > { %1113 = vsyncadd (!%p1027_p3), %s835_s11, 4294967168  ;;  %p18_p5 = scmp.ge.s32.totalorder %s1199_s30, 4   ;;  %s1410_s24 = smov %s1120_s25 }
 0x51d   : > { %s1411_s25 = smov %s1124_s26  ;;  %s1412_s26 = smov %s1210_s10 }
 0x51e   : > { %s1413_s27 = smov %s1199_s30  ;;  %20 = sbr.rel (!%p18_p5) target bundleno = 3 (0x3), region = 99 }
 0x525   :  { %854 = vsyncpa [#allocation3], 1 }
 0x526   :  { %856 = vsyncpa [#allocation3 + $0x1], 1 }

</bundles_post_ra>
